<compile_context>
chip_gen: v7x
topology: tpu7x:2x2x1
jax: 0.10.0
libtpu: 0.0.40
codegen_flags: <defaults>
</compile_context>

<pallas_src>
import jax
import jax.numpy as jnp
from jax.experimental import pallas as pl
from jax.experimental.pallas import tpu as pltpu


# ---------------------------------------------------------------------------
# Pallas kernel: channel gather as HBM -> HBM DMAs with a semaphore ring.
# ---------------------------------------------------------------------------
def _gather_dma_kernel(perm_ref, x_hbm, o_hbm, sems):
    """out[:, c, :] = x[:, perm[c], :] for refs of shape (N, C, HW) left in HBM.

    perm_ref : (C,) int32 permutation in SMEM (scalar prefetch).
    sems     : (NBUF,) DMA semaphores; up to NBUF copies kept in flight.
    """
    n_ch = o_hbm.shape[1]
    nbuf = sems.shape[0]
    prime = min(nbuf, n_ch)

    def issue(c):
        slot = c % nbuf
        pltpu.make_async_copy(
            x_hbm.at[:, pl.ds(perm_ref[c], 1), :],
            o_hbm.at[:, pl.ds(c, 1), :],
            sems.at[slot],
        ).start()

    def wait_for(c):
        slot = c % nbuf
        # Any same-shaped window works for the wait: it only consumes the
        # semaphore by the (constant) per-channel byte count.
        pltpu.make_async_copy(
            x_hbm.at[:, pl.ds(0, 1), :],
            o_hbm.at[:, pl.ds(0, 1), :],
            sems.at[slot],
        ).wait()

    # Prime the ring with up to `nbuf` outstanding copies.
    for c in range(prime):
        issue(c)

    # Steady state: retire copy i, immediately issue copy i + prime (same slot).
    if n_ch > prime:
        @pl.loop(0, n_ch - prime)
        def _(i):
            wait_for(i)
            issue(i + prime)

    # Drain the tail.
    @pl.loop(n_ch - prime, n_ch)
    def _(i):
        wait_for(i)


def rand_permute_2d(x, perm, *, num_outstanding=4):
    """Channel gather of an NCHW tensor: out[:, c] = x[:, perm[c]] (HBM->HBM DMA)."""
    N, C, H, W = x.shape
    perm = perm.astype(jnp.int32)
    x3 = x.reshape(N, C, H * W)  # free: each channel slab stays contiguous

    nbuf = max(1, min(num_outstanding, C))

    out3 = pl.pallas_call(
        _gather_dma_kernel,
        out_shape=jax.ShapeDtypeStruct((N, C, H * W), x.dtype),
        grid_spec=pltpu.PrefetchScalarGridSpec(
            num_scalar_prefetch=1,
            grid=(1,),
            in_specs=[pl.BlockSpec(memory_space=pl.ANY)],
            out_specs=pl.BlockSpec(memory_space=pl.ANY),
            scratch_shapes=[pltpu.SemaphoreType.DMA((nbuf,))],
        ),
        compiler_params=pltpu.CompilerParams(
            dimension_semantics=("arbitrary",),
        ),
    )(perm, x3)
    return out3.reshape(N, C, H, W)


# ---------------------------------------------------------------------------
# JAX ports of the surrounding InvUnit pieces (plain jnp, elementwise).
# ---------------------------------------------------------------------------
class ActNorm2d:
    def __init__(self, num_features, scale=1.0):
        self.num_features = num_features
        self.scale = scale
        self.bias = jnp.zeros((1, num_features, 1, 1), jnp.float32)
        self.logs = jnp.zeros((1, num_features, 1, 1), jnp.float32)
        self.inited = False

    def initialize_parameters(self, x):
        bias = -jnp.mean(x, axis=(0, 2, 3), keepdims=True)
        var = jnp.mean((x + bias) ** 2, axis=(0, 2, 3), keepdims=True)
        logs = jnp.log(self.scale / (jnp.sqrt(var) + 1e-6))
        self.bias, self.logs, self.inited = bias, logs, True

    def __call__(self, x, reverse=False):
        if not self.inited:
            self.initialize_parameters(x)
        if reverse:
            return x * jnp.exp(-self.logs) - self.bias
        return (x + self.bias) * jnp.exp(self.logs)


class RandPermute2d:
    """JAX/Pallas port of the PyTorch RandPermute2d (flow_permutation='shuffle')."""

    def __init__(self, num_channels, key):
        self.num_channels = num_channels
        self.indices = jax.random.permutation(key, num_channels).astype(jnp.int32)
        self.indices_inverse = jnp.argsort(self.indices).astype(jnp.int32)

    def __call__(self, x, reverse=False):
        assert x.ndim == 4
        perm = self.indices_inverse if reverse else self.indices
        return rand_permute_2d(x, perm)


class InvUnit:
    """InvUnit with flow_permutation='shuffle'; the permutation is the Pallas kernel."""

    def __init__(self, in_channels, hidden_channels, key,
                 flow_coupling="affine", use_act_norm=True):
        assert in_channels % 2 == 0
        self.in_channels = in_channels
        self.hidden_channels = hidden_channels
        self.flow_coupling = flow_coupling
        self.use_act_norm = use_act_norm
        if use_act_norm:
            self.actnorm = ActNorm2d(in_channels)
        self.permute = RandPermute2d(in_channels, key)

    def _block(self, z1):
        # TODO(synk): ResidualBlock is not defined in the reference source; the coupling
        # block ends in Conv2dZeros (zero weights & bias), so block(z1) == 0 exactly at
        # initialization regardless of ResidualBlock.
        out_ch = self.in_channels if self.flow_coupling == "affine" else self.in_channels // 2
        n, _, h, w = z1.shape
        return jnp.zeros((n, out_ch, h, w), z1.dtype)

    def __call__(self, x, reverse=False):
        return self.inv_reverse(x) if reverse else self.inv_forward(x)

    def inv_forward(self, x):
        assert x.shape[1] % 2 == 0
        if self.use_act_norm:
            x = self.actnorm(x, reverse=False)
        z = self.permute(x, reverse=False)
        z1, z2 = jnp.split(z, 2, axis=1)
        if self.flow_coupling == "additive":
            z2 = z2 + self._block(z1)
        else:
            h = self._block(z1)
            scale, shift = jnp.split(h, 2, axis=1)
            scale = jnp.exp(jax.nn.sigmoid(scale) * 2 - 1)
            z2 = (z2 + shift) * scale
        return jnp.concatenate([z1, z2], axis=1)

    def inv_reverse(self, x):
        assert x.shape[1] % 2 == 0
        z1, z2 = jnp.split(x, 2, axis=1)
        if self.flow_coupling == "additive":
            z2 = z2 - self._block(z1)
        else:
            h = self._block(z1)
            scale, shift = jnp.split(h, 2, axis=1)
            scale = jnp.exp(jax.nn.sigmoid(scale) * 2 - 1)
            z2 = z2 / scale - shift
        z = jnp.concatenate([z1, z2], axis=1)
        z = self.permute(z, reverse=True)
        if self.use_act_norm:
            z = self.actnorm(z, reverse=True)
        return z


if __name__ == "__main__":
    key = jax.random.PRNGKey(0)
    k_x, k_perm = jax.random.split(key)

    N, C, H, W = 2, 4, 16, 16
    x = jax.random.normal(k_x, (N, C, H, W), dtype=jnp.float32)

    # --- Pallas channel-gather kernel vs. reference indexing -----------------
    perm_mod = RandPermute2d(C, key=k_perm)
    y = jax.block_until_ready(perm_mod(x, reverse=False))
    y_ref = x[:, perm_mod.indices, :, :]
    assert jnp.array_equal(y, y_ref), "forward permutation mismatch"

    x_back = jax.block_until_ready(perm_mod(y, reverse=True))
    assert jnp.array_equal(x_back, x), "reverse permutation did not invert forward"

    # --- Full InvUnit (shuffle permutation, affine coupling) round trip ------
    unit = InvUnit(C, hidden_channels=8, key=k_perm)
    z = jax.block_until_ready(unit(x, reverse=False))
    x_rec = jax.block_until_ready(unit(z, reverse=True))
    assert jnp.allclose(x_rec, x, atol=1e-5, rtol=1e-5), "InvUnit round trip failed"

    print("KERNEL_OK")
</pallas_src>

<mosaic_0001>
module attributes {stable_mosaic.version = 11 : i64} {
  func.func @_gather_dma_kernel(%arg0: i32, %arg1: memref<4xi32, #tpu.memory_space<smem>>, %arg2: memref<2x4x256xf32, #tpu.memory_space<any>>, %arg3: memref<2x4x256xf32, #tpu.memory_space<any>>, %arg4: memref<4x!tpu.dma_semaphore, #tpu.memory_space<semaphore_mem>>) attributes {dimension_semantics = [#tpu.dimension_semantics<arbitrary>], iteration_bounds = array<i64: 1>, scalar_prefetch = 1 : i64, scratch_operands = 1 : i64, tpu.core_type = #tpu.core_type<tc>, window_params = [{}, {}]} {
    %c0 = arith.constant 0 : index
    %0 = memref.load %arg1[%c0] : memref<4xi32, #tpu.memory_space<smem>>
    %c0_i32 = arith.constant 0 : i32
    %c0_i32_0 = arith.constant 0 : i32
    %c0_i32_1 = arith.constant 0 : i32
    %1 = tpu.memref_slice %arg2[%c0_i32_0, %0, %c0_i32_1] : memref<2x4x256xf32, #tpu.memory_space<any>> -> memref<2x1x256xf32, #tpu.memory_space<any>>
    %c0_i32_2 = arith.constant 0 : i32
    %c0_i32_3 = arith.constant 0 : i32
    %c0_i32_4 = arith.constant 0 : i32
    %2 = tpu.memref_slice %arg3[%c0_i32_2, %c0_i32_3, %c0_i32_4] : memref<2x4x256xf32, #tpu.memory_space<any>> -> memref<2x1x256xf32, #tpu.memory_space<any>>
    %3 = tpu.memref_slice %arg4[%c0_i32] : memref<4x!tpu.dma_semaphore, #tpu.memory_space<semaphore_mem>> -> memref<1x!tpu.dma_semaphore, #tpu.memory_space<semaphore_mem>>
    %4 = tpu.memref_squeeze %3 : memref<1x!tpu.dma_semaphore, #tpu.memory_space<semaphore_mem>> -> memref<!tpu.dma_semaphore, #tpu.memory_space<semaphore_mem>>
    tpu.enqueue_dma source(%1 : memref<2x1x256xf32, #tpu.memory_space<any>>) target(%2 : memref<2x1x256xf32, #tpu.memory_space<any>>) target_semaphore(%4 : memref<!tpu.dma_semaphore, #tpu.memory_space<semaphore_mem>>)
    %c1 = arith.constant 1 : index
    %5 = memref.load %arg1[%c1] : memref<4xi32, #tpu.memory_space<smem>>
    %c1_i32 = arith.constant 1 : i32
    %c0_i32_5 = arith.constant 0 : i32
    %c0_i32_6 = arith.constant 0 : i32
    %6 = tpu.memref_slice %arg2[%c0_i32_5, %5, %c0_i32_6] : memref<2x4x256xf32, #tpu.memory_space<any>> -> memref<2x1x256xf32, #tpu.memory_space<any>>
    %c0_i32_7 = arith.constant 0 : i32
    %c1_i32_8 = arith.constant 1 : i32
    %c0_i32_9 = arith.constant 0 : i32
    %7 = tpu.memref_slice %arg3[%c0_i32_7, %c1_i32_8, %c0_i32_9] : memref<2x4x256xf32, #tpu.memory_space<any>> -> memref<2x1x256xf32, #tpu.memory_space<any>>
    %8 = tpu.memref_slice %arg4[%c1_i32] : memref<4x!tpu.dma_semaphore, #tpu.memory_space<semaphore_mem>> -> memref<1x!tpu.dma_semaphore, #tpu.memory_space<semaphore_mem>>
    %9 = tpu.memref_squeeze %8 : memref<1x!tpu.dma_semaphore, #tpu.memory_space<semaphore_mem>> -> memref<!tpu.dma_semaphore, #tpu.memory_space<semaphore_mem>>
    tpu.enqueue_dma source(%6 : memref<2x1x256xf32, #tpu.memory_space<any>>) target(%7 : memref<2x1x256xf32, #tpu.memory_space<any>>) target_semaphore(%9 : memref<!tpu.dma_semaphore, #tpu.memory_space<semaphore_mem>>)
    %c2 = arith.constant 2 : index
    %10 = memref.load %arg1[%c2] : memref<4xi32, #tpu.memory_space<smem>>
    %c2_i32 = arith.constant 2 : i32
    %c0_i32_10 = arith.constant 0 : i32
    %c0_i32_11 = arith.constant 0 : i32
    %11 = tpu.memref_slice %arg2[%c0_i32_10, %10, %c0_i32_11] : memref<2x4x256xf32, #tpu.memory_space<any>> -> memref<2x1x256xf32, #tpu.memory_space<any>>
    %c0_i32_12 = arith.constant 0 : i32
    %c2_i32_13 = arith.constant 2 : i32
    %c0_i32_14 = arith.constant 0 : i32
    %12 = tpu.memref_slice %arg3[%c0_i32_12, %c2_i32_13, %c0_i32_14] : memref<2x4x256xf32, #tpu.memory_space<any>> -> memref<2x1x256xf32, #tpu.memory_space<any>>
    %13 = tpu.memref_slice %arg4[%c2_i32] : memref<4x!tpu.dma_semaphore, #tpu.memory_space<semaphore_mem>> -> memref<1x!tpu.dma_semaphore, #tpu.memory_space<semaphore_mem>>
    %14 = tpu.memref_squeeze %13 : memref<1x!tpu.dma_semaphore, #tpu.memory_space<semaphore_mem>> -> memref<!tpu.dma_semaphore, #tpu.memory_space<semaphore_mem>>
    tpu.enqueue_dma source(%11 : memref<2x1x256xf32, #tpu.memory_space<any>>) target(%12 : memref<2x1x256xf32, #tpu.memory_space<any>>) target_semaphore(%14 : memref<!tpu.dma_semaphore, #tpu.memory_space<semaphore_mem>>)
    %c3 = arith.constant 3 : index
    %15 = memref.load %arg1[%c3] : memref<4xi32, #tpu.memory_space<smem>>
    %c3_i32 = arith.constant 3 : i32
    %c0_i32_15 = arith.constant 0 : i32
    %c0_i32_16 = arith.constant 0 : i32
    %16 = tpu.memref_slice %arg2[%c0_i32_15, %15, %c0_i32_16] : memref<2x4x256xf32, #tpu.memory_space<any>> -> memref<2x1x256xf32, #tpu.memory_space<any>>
    %c0_i32_17 = arith.constant 0 : i32
    %c3_i32_18 = arith.constant 3 : i32
    %c0_i32_19 = arith.constant 0 : i32
    %17 = tpu.memref_slice %arg3[%c0_i32_17, %c3_i32_18, %c0_i32_19] : memref<2x4x256xf32, #tpu.memory_space<any>> -> memref<2x1x256xf32, #tpu.memory_space<any>>
    %18 = tpu.memref_slice %arg4[%c3_i32] : memref<4x!tpu.dma_semaphore, #tpu.memory_space<semaphore_mem>> -> memref<1x!tpu.dma_semaphore, #tpu.memory_space<semaphore_mem>>
    %19 = tpu.memref_squeeze %18 : memref<1x!tpu.dma_semaphore, #tpu.memory_space<semaphore_mem>> -> memref<!tpu.dma_semaphore, #tpu.memory_space<semaphore_mem>>
    tpu.enqueue_dma source(%16 : memref<2x1x256xf32, #tpu.memory_space<any>>) target(%17 : memref<2x1x256xf32, #tpu.memory_space<any>>) target_semaphore(%19 : memref<!tpu.dma_semaphore, #tpu.memory_space<semaphore_mem>>)
    %c0_i32_20 = arith.constant 0 : i32
    %c4_i32 = arith.constant 4 : i32
    %20 = arith.addi %c0_i32_20, %c4_i32 : i32
    %c1_i32_21 = arith.constant 1 : i32
    scf.for %arg5 = %c0_i32_20 to %20 step %c1_i32_21  : i32 {
      %c1_i32_23 = arith.constant 1 : i32
      %21 = arith.muli %arg5, %c1_i32_23 : i32
      %c0_i32_24 = arith.constant 0 : i32
      %22 = arith.addi %c0_i32_24, %21 : i32
      %c4_i32_25 = arith.constant 4 : i32
      %c0_i32_26 = arith.constant 0 : i32
      %23 = arith.cmpi eq, %c4_i32_25, %c0_i32_26 : i32
      %c1_i32_27 = arith.constant 1 : i32
      %24 = arith.select %23, %c1_i32_27, %c4_i32_25 : i32
      %25 = arith.remsi %22, %24 : i32
      %c0_i32_28 = arith.constant 0 : i32
      %26 = arith.cmpi ne, %25, %c0_i32_28 : i32
      %c0_i32_29 = arith.constant 0 : i32
      %27 = arith.cmpi slt, %25, %c0_i32_29 : i32
      %c0_i32_30 = arith.constant 0 : i32
      %28 = arith.cmpi slt, %24, %c0_i32_30 : i32
      %29 = arith.xori %27, %28 : i1
      %30 = arith.andi %29, %26 : i1
      %31 = arith.addi %25, %24 : i32
      %32 = arith.select %30, %31, %25 : i32
      %c0_i32_31 = arith.constant 0 : i32
      %c0_i32_32 = arith.constant 0 : i32
      %c0_i32_33 = arith.constant 0 : i32
      %33 = tpu.memref_slice %arg2[%c0_i32_31, %c0_i32_32, %c0_i32_33] : memref<2x4x256xf32, #tpu.memory_space<any>> -> memref<2x1x256xf32, #tpu.memory_space<any>>
      %c0_i32_34 = arith.constant 0 : i32
      %c0_i32_35 = arith.constant 0 : i32
      %c0_i32_36 = arith.constant 0 : i32
      %34 = tpu.memref_slice %arg3[%c0_i32_34, %c0_i32_35, %c0_i32_36] : memref<2x4x256xf32, #tpu.memory_space<any>> -> memref<2x1x256xf32, #tpu.memory_space<any>>
      %35 = tpu.memref_slice %arg4[%32] : memref<4x!tpu.dma_semaphore, #tpu.memory_space<semaphore_mem>> -> memref<1x!tpu.dma_semaphore, #tpu.memory_space<semaphore_mem>>
      %36 = tpu.memref_squeeze %35 : memref<1x!tpu.dma_semaphore, #tpu.memory_space<semaphore_mem>> -> memref<!tpu.dma_semaphore, #tpu.memory_space<semaphore_mem>>
      tpu.wait_dma2 semaphore(%36 : memref<!tpu.dma_semaphore, #tpu.memory_space<semaphore_mem>>) src(%33 : memref<2x1x256xf32, #tpu.memory_space<any>>) dst(%34 : memref<2x1x256xf32, #tpu.memory_space<any>>)
    }
    %c4_i32_22 = arith.constant 4 : i32
    return
  }
}

</mosaic_0001>

<bundles_post_ra>
// kernel: tpu_custom_call.1
= control target key start
LH: loop header
LB: loop body
LE: loop exit
PB: predicated region body
PF: predicated region fallthrough
CT: control target
= control target key end

     0   :  { %s332_s0 = inlined_call_operand.hbm [shape: s32[4], index: 0, kind: input, shape index: {}]   ;;  %s333_s1 = inlined_call_operand.hbm [shape: f32[2,4,256], index: 1, kind: input, shape index: {}]   ;;  %s334_s2 = inlined_call_operand.hbm [shape: f32[2,4,256], index: 2, kind: output, shape index: {}]  }
   0x1   :  { %s231_s11 = scalar_lea.hbm %s332_s0, 16 }
   0x2   :  { %p232_p0 = scmp.ne.s32.totalorder %s332_s0, %s231_s11  ;;  %p235_p1 = scmp.lt.u32.totalorder %s231_s11, %s332_s0 }
   0x4   :  { %p237_p2 = pnand %p235_p1, %p232_p0 }
   0x6   :  { %240 = shalt.err (!%p237_p2)  }
   0x7   :  { %s253_s16 = smov [#allocation4]  }
   0x8   :  { %8 = dma.hbm_to_smem %s332_s0, 16, %s253_s16, [#allocation3] }
   0x9   :  { %245 = dma.done.wait [#allocation3], 16 }
   0xa   :  { %246 = vsyncadd [#allocation3], 4294967280 }
   0xb   :  { %10 = sfence }
   0xc   :  { %s11_s19 = sld [smem:[#allocation4]]  ;;  %s254_s20 = smov 64  }
   0xd   :  { %30 = sst [smem:[#allocation6]] %s254_s20  ;;  %s255_s21 = smov 1  }
   0xe   :  { %32 = sst [smem:[#allocation6 + $0x1]] %s254_s20  ;;  %s256_s29 = smov [#allocation2]  }
   0xf   :  { %34 = sst [smem:[#allocation6 + $0x2]] %s255_s21  ;;  %s257_s30 = smov [#allocation5]  }
  0x10   :  { %s258_s3 = smov 0   ;;  %s44_s9 = scalar_lea.hbm %s334_s2, 16 }
  0x11   :  { %s259_s18 = smov [#allocation2 + $0x1]   ;;  %s262_s7 = smov [#allocation9]  }
  0x12   :  { %s12_s22 = sshrl.u32 %s11_s19, 2  ;;  %s13_s23 = sand.u32 3, %s11_s19  }
  0x13   :  { %s193_s24 = sshll.u32 %s12_s22, 3  ;;  %s260_s19 = smov [#allocation7]  }
  0x14   :  { %s15_s25 = sadd.s32 %s193_s24, %s13_s23  ;;  %s264_s23 = smov [#allocation11]  }
  0x15   :  { %s194_s26 = sshll.u32 %s15_s25, 4  ;;  %s72_s25 = scalar_lea.hbm %s334_s2, 32 }
  0x16   :  { %s17_s0 = scalar_lea.hbm %s333_s1, %s194_s26 }
  0x17   :  { %36 = dma.general %s17_s0, 64, %s334_s2, %s256_s29, %s257_s30, [#allocation6], %s258_s3, 0  }
  0x18   :  { %s195_s6 = sld [smem:[#allocation4 + $0x1]]  ;;  %58 = sst [smem:[#allocation8]] %s254_s20 }
  0x19   :  { %60 = sst [smem:[#allocation8 + $0x1]] %s254_s20 }
  0x1a   :  { %62 = sst [smem:[#allocation8 + $0x2]] %s255_s21 }
  0x1e   :  { %s38_s10 = sshrl.u32 %s195_s6, 2  ;;  %s39_s11 = sand.u32 3, %s195_s6  }
  0x1f   :  { %s196_s12 = sshll.u32 %s38_s10, 3  ;;  %s261_s6 = smov [#allocation2 + $0x2]  }
  0x20   :  { %s41_s13 = sadd.s32 %s196_s12, %s39_s11  ;;  %s100_s11 = scalar_lea.hbm %s334_s2, 48 }
  0x21   :  { %s197_s14 = sshll.u32 %s41_s13, 4 }
  0x22   :  { %s43_s17 = scalar_lea.hbm %s333_s1, %s197_s14 }
  0x23   :  { %64 = dma.general %s43_s17, 64, %s44_s9, %s259_s18, %s260_s19, [#allocation8], %s258_s3, 0  }
  0x24   :  { %s198_s22 = sld [smem:[#allocation4 + $0x2]]  ;;  %86 = sst [smem:[#allocation10]] %s254_s20 }
  0x25   :  { %88 = sst [smem:[#allocation10 + $0x1]] %s254_s20 }
  0x26   :  { %90 = sst [smem:[#allocation10 + $0x2]] %s255_s21 }
  0x2a   :  { %s66_s26 = sshrl.u32 %s198_s22, 2  ;;  %s67_s27 = sand.u32 3, %s198_s22  }
  0x2b   :  { %s199_s28 = sshll.u32 %s66_s26, 3  ;;  %s263_s22 = smov [#allocation2 + $0x3]  }
  0x2c   :  { %s69_s0 = sadd.s32 %s199_s28, %s67_s27 }
  0x2d   :  { %s200_s29 = sshll.u32 %s69_s0, 4 }
  0x2e   :  { %s71_s5 = scalar_lea.hbm %s333_s1, %s200_s29 }
  0x2f   :  { %92 = dma.general %s71_s5, 64, %s72_s25, %s261_s6, %s262_s7, [#allocation10], %s258_s3, 0  }
  0x30   :  { %s201_s8 = sld [smem:[#allocation4 + $0x3]]  ;;  %114 = sst [smem:[#allocation12]] %s254_s20 }
  0x31   :  { %116 = sst [smem:[#allocation12 + $0x1]] %s254_s20  ;;  %s249_s20 = smov 0  }
  0x32   :  { %118 = sst [smem:[#allocation12 + $0x2]] %s255_s21 }
  0x36   :  { %s94_s12 = sshrl.u32 %s201_s8, 2  ;;  %s95_s13 = sand.u32 3, %s201_s8  }
  0x37   :  { %s202_s14 = sshll.u32 %s94_s12, 3 }
  0x38   :  { %s97_s15 = sadd.s32 %s202_s14, %s95_s13 }
  0x39   :  { %s203_s16 = sshll.u32 %s97_s15, 4 }
  0x3a   :  { %s99_s19 = scalar_lea.hbm %s333_s1, %s203_s16 }
  0x3b   :  { %120 = dma.general %s99_s19, 64, %s100_s11, %s263_s22, %s264_s23, [#allocation12], %s258_s3, 0  }
  0x3c LB: > { %p127_p3 = scmp.lt.s32.totalorder %s251_s20, 0  ;;  %s128_s21 = ssub.s32 0, %s251_s20  ;;  %s251_s20 = sphi %s249_s20, %s126_s20  }
  0x3d   : > { %s204_s2 = smin.u32 %s251_s20, %s128_s21 }
  0x3e   : > { %s130_s24 = sand.u32 3, %s204_s2  }
  0x3f   : > { %s131_s25 = ssub.s32 0, %s130_s24 }
  0x40   : > { %s336_s25 = smov (!%p127_p3, %s131_s25), %s130_s24 }
  0x41   : > { %p206_p4 = scmp.lt.s32.totalorder %s336_s25, 0  ;;  %s137_s26 = sadd.s32 4, %s336_s25 }
  0x43   : > { %s338_s26 = smov (!%p206_p4, %s137_s26), %s336_s25 }
  0x44   : > { %s139_s27 = scalar_lea.sflag [#allocation2], %s338_s26 }
  0x45   : > { %247 = dma.done.wait %s139_s27, 64 }
  0x46   : > { %248 = vsyncadd %s139_s27, 4294967232  ;;  %s126_s20 = sadd.s32 1, %s251_s20  }
  0x47   : > { %p123_p5 = scmp.ge.s32.totalorder %s126_s20, 4  }
  0x49   :  { %125 = sbr.rel (!%p123_p5) target bundleno = 60 (0x3c), region = 41 }
  0x50   :  { %144 = vsyncmov [#allocation2] }
  0x53   :  { %s145_s1 = vpop.sfrf %144 }
  0x54   :  { %p207_p6 = scmp.ne.s32.totalorder %s145_s1, 0 }
  0x56   :  { %149 = shalt.err (%p207_p6)  }
  0x57   :  { %151 = vsyncmov [#allocation2 + $0x1] }
  0x5a   :  { %s152_s3 = vpop.sfrf %151 }
  0x5b   :  { %p208_p7 = scmp.ne.s32.totalorder %s152_s3, 0 }
  0x5d   :  { %156 = shalt.err (%p208_p7)  }
  0x5e   :  { %158 = vsyncmov [#allocation2 + $0x2] }
  0x61   :  { %s159_s28 = vpop.sfrf %158 }
  0x62   :  { %p209_p8 = scmp.ne.s32.totalorder %s159_s28, 0 }
  0x64   :  { %163 = shalt.err (%p209_p8)  }
  0x65   :  { %165 = vsyncmov [#allocation2 + $0x3] }
  0x68   :  { %s166_s0 = vpop.sfrf %165 }
  0x69   :  { %p210_p9 = scmp.ne.s32.totalorder %s166_s0, 0 }
  0x6b   :  { %170 = shalt.err (%p210_p9)  }

</bundles_post_ra>
